<compile_context>
chip_gen: v7x
topology: tpu7x:2x2x1
jax: 0.10.0
libtpu: 0.0.40
codegen_flags: <defaults>
</compile_context>

<pallas_src>
import functools

import jax
import jax.numpy as jnp
from jax import lax
from jax.experimental import pallas as pl
from jax.experimental.pallas import tpu as pltpu


def _sum_sq(x):
    return jnp.sum(x * x)


def _gx_sq_sum(vb, W):
    """Sum of Sobel-x^2 over a block of rows of v (vertically smoothed diff).

    With zero padding, gx[., j] = v[., j+1] - v[., j-1] (missing neighbours are
    zero), so per row:
        sum_j gx^2 = sum_{j=1..W-2} (v[j+1] - v[j-1])^2 + v[1]^2 + v[W-2]^2.
    """
    inner = vb[..., 2:W] - vb[..., 0:W - 2]
    e0 = vb[..., 1:2]
    e1 = vb[..., W - 2:W - 1]
    return _sum_sq(inner) + jnp.sum(e0 * e0 + e1 * e1)


def _gy_sq_sum(hb, H):
    """Sum of Sobel-y^2 over a block of columns of h (horizontally smoothed diff).

    gy[i, .] = h[i+1, .] - h[i-1, .] with zero padding, so per column:
        sum_i gy^2 = sum_{i=1..H-2} (h[i+1] - h[i-1])^2 + h[1]^2 + h[H-2]^2.
    """
    inner = hb[:, 2:H, :] - hb[:, 0:H - 2, :]
    e0 = hb[:, 1:2, :]
    e1 = hb[:, H - 2:H - 1, :]
    return _sum_sq(inner) + jnp.sum(e0 * e0 + e1 * e1)


def _chunk_partial(d, H, W):
    """mse_sum + 0.01 * (sum gx^2 + sum gy^2) for a chunk of difference images.

    d: (c, H, W) f32 with d = pred - true.  Since conv2d is linear,
    conv(pred) - conv(true) == conv(d); the padding=1 zero border is handled by
    the interior/boundary decomposition of the separable filter.
    """
    mse = _sum_sq(d)

    # Vertical (1, 2, 1) smoothing -> rows of v (zero rows outside the image).
    v_mid = d[:, 0:H - 2, :] + 2.0 * d[:, 1:H - 1, :] + d[:, 2:H, :]  # rows 1..H-2
    v_top = 2.0 * d[:, 0:1, :] + d[:, 1:2, :]                          # row 0
    v_bot = d[:, H - 2:H - 1, :] + 2.0 * d[:, H - 1:H, :]              # row H-1
    gx_sum = (_gx_sq_sum(v_mid, W) + _gx_sq_sum(v_top, W)
              + _gx_sq_sum(v_bot, W))

    # Horizontal (1, 2, 1) smoothing -> columns of h (zero cols outside).
    h_mid = d[:, :, 0:W - 2] + 2.0 * d[:, :, 1:W - 1] + d[:, :, 2:W]   # cols 1..W-2
    h_lft = 2.0 * d[:, :, 0:1] + d[:, :, 1:2]                           # col 0
    h_rgt = d[:, :, W - 2:W - 1] + 2.0 * d[:, :, W - 1:W]               # col W-1
    gy_sum = (_gy_sq_sum(h_mid, H) + _gy_sq_sum(h_lft, H)
              + _gy_sq_sum(h_rgt, H))

    return mse + 0.01 * (gx_sum + gy_sum)


def _mse_sobel_kernel(pred_ref, true_ref, out_ref, acc_ref, *,
                      H, W, chunk, n_chunks, inv_n):
    b = pl.program_id(0)

    @pl.when(b == 0)
    def _init():
        acc_ref[0] = 0.0

    def body(c, acc):
        s = pl.multiple_of(c * chunk, chunk)
        p = pred_ref[pl.ds(s, chunk)].astype(jnp.float32)   # (chunk, H, W)
        t = true_ref[pl.ds(s, chunk)].astype(jnp.float32)
        return acc + _chunk_partial(p - t, H, W)

    # One SMEM read-modify-write per grid step.
    acc_ref[0] += lax.fori_loop(0, n_chunks, body, jnp.zeros((), jnp.float32))

    @pl.when(b == pl.num_programs(0) - 1)
    def _finalize():
        out_ref[0] = acc_ref[0] * inv_n


def mse_sobel_loss(output, target):
    """output, target: (N, H, W, 1).  Returns scalar MSE_Sobel loss (mask=None)."""
    # TODO(synk): the optional boolean `mask` advanced-indexing path of the
    # PyTorch module is not implemented; only the mask=None path is supported.
    N, H, W, C = output.shape
    assert C == 1, "Sobel conv2d with a (1,1,3,3) filter requires 1 channel"
    assert H >= 3 and W >= 3, "Sobel boundary decomposition needs H, W >= 3"

    pred = output.reshape(N, H, W)   # free contiguous reshape, no HBM copy
    true = target.reshape(N, H, W)

    HW = H * W
    # Images per inner fori_loop iteration: keep live temporaries to a few vregs.
    chunk = max(1, min(4096 // HW, N))
    # Images per grid block: ~512 KiB per input block, a multiple of `chunk`.
    target_imgs = max(1, (512 * 1024) // (HW * 4))
    b_blk = max(chunk, (target_imgs // chunk) * chunk)
    b_blk = min(b_blk, pl.cdiv(N, chunk) * chunk)
    grid = pl.cdiv(N, b_blk)
    n_pad = grid * b_blk
    if n_pad != N:
        # TODO(synk): for large ragged N, mask the tail images in-kernel instead
        # of this (batch-only) zero pad; zero-padded images contribute 0 to all sums.
        pad = ((0, n_pad - N), (0, 0), (0, 0))
        pred = jnp.pad(pred, pad)
        true = jnp.pad(true, pad)
    n_chunks = b_blk // chunk

    kernel = functools.partial(
        _mse_sobel_kernel, H=H, W=W, chunk=chunk, n_chunks=n_chunks,
        inv_n=1.0 / float(N * H * W))

    loss = pl.pallas_call(
        kernel,
        out_shape=jax.ShapeDtypeStruct((1,), jnp.float32),
        grid_spec=pltpu.PrefetchScalarGridSpec(
            num_scalar_prefetch=0,
            grid=(grid,),
            in_specs=[
                pl.BlockSpec((b_blk, H, W), lambda b: (b, 0, 0)),
                pl.BlockSpec((b_blk, H, W), lambda b: (b, 0, 0)),
            ],
            out_specs=pl.BlockSpec(memory_space=pltpu.MemorySpace.SMEM),
            scratch_shapes=[pltpu.SMEM((1,), jnp.float32)],
        ),
        # TODO(synk): on v7x, emitting per-block partial sums with a 'parallel'
        # grid (reduced in JAX) instead of the serial SMEM accumulator would
        # unlock the second TensorCore.
        compiler_params=pltpu.CompilerParams(
            dimension_semantics=("arbitrary",),
            vmem_limit_bytes=32 * 1024 * 1024),
    )(pred, true)
    return loss[0]


def _reference(output, target):
    """Pure-JAX reference reproducing the PyTorch forward (mask=None)."""
    sobel_x = jnp.array([[-1., 0., 1.], [-2., 0., 2.], [-1., 0., 1.]], jnp.float32)
    sobel_y = jnp.array([[-1., -2., -1.], [0., 0., 0.], [1., 2., 1.]], jnp.float32)
    p = output[..., 0]
    t = target[..., 0]

    def conv(x, k):
        xp = jnp.pad(x, ((0, 0), (1, 1), (1, 1)))
        out = jnp.zeros_like(x)
        H, W = x.shape[1], x.shape[2]
        for di in range(3):
            for dj in range(3):
                out = out + k[di, dj] * xp[:, di:di + H, dj:dj + W]
        return out

    mse = jnp.mean((output - target) ** 2)
    lx = jnp.mean((conv(p, sobel_x) - conv(t, sobel_x)) ** 2)
    ly = jnp.mean((conv(p, sobel_y) - conv(t, sobel_y)) ** 2)
    return 0.01 * (lx + ly) + mse


if __name__ == "__main__":
    key = jax.random.PRNGKey(0)
    k1, k2 = jax.random.split(key)
    N, H, W = 2, 16, 16
    output = jax.random.normal(k1, (N, H, W, 1), dtype=jnp.float32)
    target = jax.random.normal(k2, (N, H, W, 1), dtype=jnp.float32)

    loss = jax.jit(mse_sobel_loss)(output, target)
    jax.block_until_ready(loss)

    ref = _reference(output, target)
    assert jnp.allclose(loss, ref, rtol=1e-4, atol=1e-6), (float(loss), float(ref))
    print("KERNEL_OK")
</pallas_src>

<mosaic_0001>
module attributes {stable_mosaic.version = 11 : i64} {
  func.func @_mse_sobel_kernel(%arg0: i32, %arg1: memref<2x16x16xf32, #tpu.memory_space<vmem>>, %arg2: memref<2x16x16xf32, #tpu.memory_space<vmem>>, %arg3: memref<1xf32, #tpu.memory_space<smem>>, %arg4: memref<1xf32, #tpu.memory_space<smem>>) attributes {dimension_semantics = [#tpu.dimension_semantics<arbitrary>], iteration_bounds = array<i64: 1>, scalar_prefetch = 0 : i64, scratch_operands = 1 : i64, tpu.core_type = #tpu.core_type<tc>, window_params = [{transform_indices = @transform_0, window_bounds = array<i64: 2, 16, 16>}, {transform_indices = @transform_1, window_bounds = array<i64: 2, 16, 16>}, {transform_indices = @transform_2, window_bounds = array<i64: 1>}]} {
    %c0_i32 = arith.constant 0 : i32
    %0 = arith.cmpi eq, %arg0, %c0_i32 : i32
    %1 = arith.extui %0 : i1 to i32
    %c0_i32_0 = arith.constant 0 : i32
    %2 = arith.cmpi ne, %1, %c0_i32_0 : i32
    scf.if %2 {
      %cst_29 = arith.constant 0.000000e+00 : f32
      %c0_30 = arith.constant 0 : index
      %171 = memref.load %arg4[%c0_30] : memref<1xf32, #tpu.memory_space<smem>>
      memref.store %cst_29, %arg4[%c0_30] : memref<1xf32, #tpu.memory_space<smem>>
    } else {
    }
    %c0 = arith.constant 0 : index
    %3 = memref.load %arg4[%c0] : memref<1xf32, #tpu.memory_space<smem>>
    %cst = arith.constant 0.000000e+00 : f32
    %c0_i32_1 = arith.constant 0 : i32
    %c2_i32 = arith.constant 2 : i32
    %4 = arith.muli %c0_i32_1, %c2_i32 : i32
    %5 = tpu.assume_multiple %4, 2 : i32
    %6 = arith.index_cast %5 : i32 to index
    %c0_2 = arith.constant 0 : index
    %c0_3 = arith.constant 0 : index
    %7 = vector.load %arg1[%6, %c0_2, %c0_3] : memref<2x16x16xf32, #tpu.memory_space<vmem>>, vector<2x16x16xf32>
    %8 = arith.index_cast %5 : i32 to index
    %c0_4 = arith.constant 0 : index
    %c0_5 = arith.constant 0 : index
    %9 = vector.load %arg2[%8, %c0_4, %c0_5] : memref<2x16x16xf32, #tpu.memory_space<vmem>>, vector<2x16x16xf32>
    %10 = arith.subf %7, %9 : vector<2x16x16xf32>
    %11 = arith.mulf %10, %10 : vector<2x16x16xf32>
    %12 = vector.shape_cast %11 : vector<2x16x16xf32> to vector<1x2x16x16xf32>
    %cst_6 = arith.constant dense<0.000000e+00> : vector<1xf32>
    %13 = vector.multi_reduction <add>, %12, %cst_6 [1, 2, 3] : vector<1x2x16x16xf32> to vector<1xf32>
    %14 = vector.shape_cast %13 : vector<1xf32> to vector<1x1x1x1xf32>
    %15 = vector.extract %14[0, 0, 0, 0] : f32 from vector<1x1x1x1xf32>
    %16 = vector.extract_strided_slice %10 {offsets = [0, 0, 0], sizes = [2, 14, 16], strides = [1, 1, 1]} : vector<2x16x16xf32> to vector<2x14x16xf32>
    %17 = vector.extract_strided_slice %10 {offsets = [0, 1, 0], sizes = [2, 14, 16], strides = [1, 1, 1]} : vector<2x16x16xf32> to vector<2x14x16xf32>
    %cst_7 = arith.constant 2.000000e+00 : f32
    %18 = vector.broadcast %cst_7 : f32 to vector<2x14x16xf32>
    %19 = arith.mulf %18, %17 : vector<2x14x16xf32>
    %20 = arith.addf %16, %19 : vector<2x14x16xf32>
    %21 = vector.extract_strided_slice %10 {offsets = [0, 2, 0], sizes = [2, 14, 16], strides = [1, 1, 1]} : vector<2x16x16xf32> to vector<2x14x16xf32>
    %22 = arith.addf %20, %21 : vector<2x14x16xf32>
    %23 = vector.extract_strided_slice %10 {offsets = [0, 0, 0], sizes = [2, 1, 16], strides = [1, 1, 1]} : vector<2x16x16xf32> to vector<2x1x16xf32>
    %cst_8 = arith.constant 2.000000e+00 : f32
    %24 = vector.broadcast %cst_8 : f32 to vector<2x1x16xf32>
    %25 = arith.mulf %24, %23 : vector<2x1x16xf32>
    %26 = vector.extract_strided_slice %10 {offsets = [0, 1, 0], sizes = [2, 1, 16], strides = [1, 1, 1]} : vector<2x16x16xf32> to vector<2x1x16xf32>
    %27 = arith.addf %25, %26 : vector<2x1x16xf32>
    %28 = vector.extract_strided_slice %10 {offsets = [0, 14, 0], sizes = [2, 1, 16], strides = [1, 1, 1]} : vector<2x16x16xf32> to vector<2x1x16xf32>
    %29 = vector.extract_strided_slice %10 {offsets = [0, 15, 0], sizes = [2, 1, 16], strides = [1, 1, 1]} : vector<2x16x16xf32> to vector<2x1x16xf32>
    %cst_9 = arith.constant 2.000000e+00 : f32
    %30 = vector.broadcast %cst_9 : f32 to vector<2x1x16xf32>
    %31 = arith.mulf %30, %29 : vector<2x1x16xf32>
    %32 = arith.addf %28, %31 : vector<2x1x16xf32>
    %33 = vector.extract_strided_slice %22 {offsets = [0, 0, 2], sizes = [2, 14, 14], strides = [1, 1, 1]} : vector<2x14x16xf32> to vector<2x14x14xf32>
    %34 = vector.extract_strided_slice %22 {offsets = [0, 0, 0], sizes = [2, 14, 14], strides = [1, 1, 1]} : vector<2x14x16xf32> to vector<2x14x14xf32>
    %35 = arith.subf %33, %34 : vector<2x14x14xf32>
    %36 = vector.extract_strided_slice %22 {offsets = [0, 0, 1], sizes = [2, 14, 1], strides = [1, 1, 1]} : vector<2x14x16xf32> to vector<2x14x1xf32>
    %37 = vector.extract_strided_slice %22 {offsets = [0, 0, 14], sizes = [2, 14, 1], strides = [1, 1, 1]} : vector<2x14x16xf32> to vector<2x14x1xf32>
    %38 = arith.mulf %35, %35 : vector<2x14x14xf32>
    %39 = vector.shape_cast %38 : vector<2x14x14xf32> to vector<1x2x14x14xf32>
    %cst_10 = arith.constant dense<0.000000e+00> : vector<1xf32>
    %40 = vector.multi_reduction <add>, %39, %cst_10 [1, 2, 3] : vector<1x2x14x14xf32> to vector<1xf32>
    %41 = vector.shape_cast %40 : vector<1xf32> to vector<1x1x1x1xf32>
    %42 = vector.extract %41[0, 0, 0, 0] : f32 from vector<1x1x1x1xf32>
    %43 = arith.mulf %36, %36 : vector<2x14x1xf32>
    %44 = arith.mulf %37, %37 : vector<2x14x1xf32>
    %45 = arith.addf %43, %44 : vector<2x14x1xf32>
    %46 = vector.shape_cast %45 : vector<2x14x1xf32> to vector<1x2x14x1xf32>
    %cst_11 = arith.constant dense<0.000000e+00> : vector<1xf32>
    %47 = vector.multi_reduction <add>, %46, %cst_11 [1, 2, 3] : vector<1x2x14x1xf32> to vector<1xf32>
    %48 = vector.shape_cast %47 : vector<1xf32> to vector<1x1x1x1xf32>
    %49 = vector.extract %48[0, 0, 0, 0] : f32 from vector<1x1x1x1xf32>
    %50 = arith.addf %42, %49 : f32
    %51 = vector.extract_strided_slice %27 {offsets = [0, 0, 2], sizes = [2, 1, 14], strides = [1, 1, 1]} : vector<2x1x16xf32> to vector<2x1x14xf32>
    %52 = vector.extract_strided_slice %27 {offsets = [0, 0, 0], sizes = [2, 1, 14], strides = [1, 1, 1]} : vector<2x1x16xf32> to vector<2x1x14xf32>
    %53 = arith.subf %51, %52 : vector<2x1x14xf32>
    %54 = vector.extract_strided_slice %27 {offsets = [0, 0, 1], sizes = [2, 1, 1], strides = [1, 1, 1]} : vector<2x1x16xf32> to vector<2x1x1xf32>
    %55 = vector.extract_strided_slice %27 {offsets = [0, 0, 14], sizes = [2, 1, 1], strides = [1, 1, 1]} : vector<2x1x16xf32> to vector<2x1x1xf32>
    %56 = arith.mulf %53, %53 : vector<2x1x14xf32>
    %57 = vector.shape_cast %56 : vector<2x1x14xf32> to vector<1x2x1x14xf32>
    %cst_12 = arith.constant dense<0.000000e+00> : vector<1xf32>
    %58 = vector.multi_reduction <add>, %57, %cst_12 [1, 2, 3] : vector<1x2x1x14xf32> to vector<1xf32>
    %59 = vector.shape_cast %58 : vector<1xf32> to vector<1x1x1x1xf32>
    %60 = vector.extract %59[0, 0, 0, 0] : f32 from vector<1x1x1x1xf32>
    %61 = arith.mulf %54, %54 : vector<2x1x1xf32>
    %62 = arith.mulf %55, %55 : vector<2x1x1xf32>
    %63 = arith.addf %61, %62 : vector<2x1x1xf32>
    %64 = vector.shape_cast %63 : vector<2x1x1xf32> to vector<1x2x1x1xf32>
    %cst_13 = arith.constant dense<0.000000e+00> : vector<1xf32>
    %65 = vector.multi_reduction <add>, %64, %cst_13 [1, 2, 3] : vector<1x2x1x1xf32> to vector<1xf32>
    %66 = vector.shape_cast %65 : vector<1xf32> to vector<1x1x1x1xf32>
    %67 = vector.extract %66[0, 0, 0, 0] : f32 from vector<1x1x1x1xf32>
    %68 = arith.addf %60, %67 : f32
    %69 = arith.addf %50, %68 : f32
    %70 = vector.extract_strided_slice %32 {offsets = [0, 0, 2], sizes = [2, 1, 14], strides = [1, 1, 1]} : vector<2x1x16xf32> to vector<2x1x14xf32>
    %71 = vector.extract_strided_slice %32 {offsets = [0, 0, 0], sizes = [2, 1, 14], strides = [1, 1, 1]} : vector<2x1x16xf32> to vector<2x1x14xf32>
    %72 = arith.subf %70, %71 : vector<2x1x14xf32>
    %73 = vector.extract_strided_slice %32 {offsets = [0, 0, 1], sizes = [2, 1, 1], strides = [1, 1, 1]} : vector<2x1x16xf32> to vector<2x1x1xf32>
    %74 = vector.extract_strided_slice %32 {offsets = [0, 0, 14], sizes = [2, 1, 1], strides = [1, 1, 1]} : vector<2x1x16xf32> to vector<2x1x1xf32>
    %75 = arith.mulf %72, %72 : vector<2x1x14xf32>
    %76 = vector.shape_cast %75 : vector<2x1x14xf32> to vector<1x2x1x14xf32>
    %cst_14 = arith.constant dense<0.000000e+00> : vector<1xf32>
    %77 = vector.multi_reduction <add>, %76, %cst_14 [1, 2, 3] : vector<1x2x1x14xf32> to vector<1xf32>
    %78 = vector.shape_cast %77 : vector<1xf32> to vector<1x1x1x1xf32>
    %79 = vector.extract %78[0, 0, 0, 0] : f32 from vector<1x1x1x1xf32>
    %80 = arith.mulf %73, %73 : vector<2x1x1xf32>
    %81 = arith.mulf %74, %74 : vector<2x1x1xf32>
    %82 = arith.addf %80, %81 : vector<2x1x1xf32>
    %83 = vector.shape_cast %82 : vector<2x1x1xf32> to vector<1x2x1x1xf32>
    %cst_15 = arith.constant dense<0.000000e+00> : vector<1xf32>
    %84 = vector.multi_reduction <add>, %83, %cst_15 [1, 2, 3] : vector<1x2x1x1xf32> to vector<1xf32>
    %85 = vector.shape_cast %84 : vector<1xf32> to vector<1x1x1x1xf32>
    %86 = vector.extract %85[0, 0, 0, 0] : f32 from vector<1x1x1x1xf32>
    %87 = arith.addf %79, %86 : f32
    %88 = arith.addf %69, %87 : f32
    %89 = vector.extract_strided_slice %10 {offsets = [0, 0, 0], sizes = [2, 16, 14], strides = [1, 1, 1]} : vector<2x16x16xf32> to vector<2x16x14xf32>
    %90 = vector.extract_strided_slice %10 {offsets = [0, 0, 1], sizes = [2, 16, 14], strides = [1, 1, 1]} : vector<2x16x16xf32> to vector<2x16x14xf32>
    %cst_16 = arith.constant 2.000000e+00 : f32
    %91 = vector.broadcast %cst_16 : f32 to vector<2x16x14xf32>
    %92 = arith.mulf %91, %90 : vector<2x16x14xf32>
    %93 = arith.addf %89, %92 : vector<2x16x14xf32>
    %94 = vector.extract_strided_slice %10 {offsets = [0, 0, 2], sizes = [2, 16, 14], strides = [1, 1, 1]} : vector<2x16x16xf32> to vector<2x16x14xf32>
    %95 = arith.addf %93, %94 : vector<2x16x14xf32>
    %96 = vector.extract_strided_slice %10 {offsets = [0, 0, 0], sizes = [2, 16, 1], strides = [1, 1, 1]} : vector<2x16x16xf32> to vector<2x16x1xf32>
    %cst_17 = arith.constant 2.000000e+00 : f32
    %97 = vector.broadcast %cst_17 : f32 to vector<2x16x1xf32>
    %98 = arith.mulf %97, %96 : vector<2x16x1xf32>
    %99 = vector.extract_strided_slice %10 {offsets = [0, 0, 1], sizes = [2, 16, 1], strides = [1, 1, 1]} : vector<2x16x16xf32> to vector<2x16x1xf32>
    %100 = arith.addf %98, %99 : vector<2x16x1xf32>
    %101 = vector.extract_strided_slice %10 {offsets = [0, 0, 14], sizes = [2, 16, 1], strides = [1, 1, 1]} : vector<2x16x16xf32> to vector<2x16x1xf32>
    %102 = vector.extract_strided_slice %10 {offsets = [0, 0, 15], sizes = [2, 16, 1], strides = [1, 1, 1]} : vector<2x16x16xf32> to vector<2x16x1xf32>
    %cst_18 = arith.constant 2.000000e+00 : f32
    %103 = vector.broadcast %cst_18 : f32 to vector<2x16x1xf32>
    %104 = arith.mulf %103, %102 : vector<2x16x1xf32>
    %105 = arith.addf %101, %104 : vector<2x16x1xf32>
    %106 = vector.extract_strided_slice %95 {offsets = [0, 2, 0], sizes = [2, 14, 14], strides = [1, 1, 1]} : vector<2x16x14xf32> to vector<2x14x14xf32>
    %107 = vector.extract_strided_slice %95 {offsets = [0, 0, 0], sizes = [2, 14, 14], strides = [1, 1, 1]} : vector<2x16x14xf32> to vector<2x14x14xf32>
    %108 = arith.subf %106, %107 : vector<2x14x14xf32>
    %109 = vector.extract_strided_slice %95 {offsets = [0, 1, 0], sizes = [2, 1, 14], strides = [1, 1, 1]} : vector<2x16x14xf32> to vector<2x1x14xf32>
    %110 = vector.extract_strided_slice %95 {offsets = [0, 14, 0], sizes = [2, 1, 14], strides = [1, 1, 1]} : vector<2x16x14xf32> to vector<2x1x14xf32>
    %111 = arith.mulf %108, %108 : vector<2x14x14xf32>
    %112 = vector.shape_cast %111 : vector<2x14x14xf32> to vector<1x2x14x14xf32>
    %cst_19 = arith.constant dense<0.000000e+00> : vector<1xf32>
    %113 = vector.multi_reduction <add>, %112, %cst_19 [1, 2, 3] : vector<1x2x14x14xf32> to vector<1xf32>
    %114 = vector.shape_cast %113 : vector<1xf32> to vector<1x1x1x1xf32>
    %115 = vector.extract %114[0, 0, 0, 0] : f32 from vector<1x1x1x1xf32>
    %116 = arith.mulf %109, %109 : vector<2x1x14xf32>
    %117 = arith.mulf %110, %110 : vector<2x1x14xf32>
    %118 = arith.addf %116, %117 : vector<2x1x14xf32>
    %119 = vector.shape_cast %118 : vector<2x1x14xf32> to vector<1x2x1x14xf32>
    %cst_20 = arith.constant dense<0.000000e+00> : vector<1xf32>
    %120 = vector.multi_reduction <add>, %119, %cst_20 [1, 2, 3] : vector<1x2x1x14xf32> to vector<1xf32>
    %121 = vector.shape_cast %120 : vector<1xf32> to vector<1x1x1x1xf32>
    %122 = vector.extract %121[0, 0, 0, 0] : f32 from vector<1x1x1x1xf32>
    %123 = arith.addf %115, %122 : f32
    %124 = vector.extract_strided_slice %100 {offsets = [0, 2, 0], sizes = [2, 14, 1], strides = [1, 1, 1]} : vector<2x16x1xf32> to vector<2x14x1xf32>
    %125 = vector.extract_strided_slice %100 {offsets = [0, 0, 0], sizes = [2, 14, 1], strides = [1, 1, 1]} : vector<2x16x1xf32> to vector<2x14x1xf32>
    %126 = arith.subf %124, %125 : vector<2x14x1xf32>
    %127 = vector.extract_strided_slice %100 {offsets = [0, 1, 0], sizes = [2, 1, 1], strides = [1, 1, 1]} : vector<2x16x1xf32> to vector<2x1x1xf32>
    %128 = vector.extract_strided_slice %100 {offsets = [0, 14, 0], sizes = [2, 1, 1], strides = [1, 1, 1]} : vector<2x16x1xf32> to vector<2x1x1xf32>
    %129 = arith.mulf %126, %126 : vector<2x14x1xf32>
    %130 = vector.shape_cast %129 : vector<2x14x1xf32> to vector<1x2x14x1xf32>
    %cst_21 = arith.constant dense<0.000000e+00> : vector<1xf32>
    %131 = vector.multi_reduction <add>, %130, %cst_21 [1, 2, 3] : vector<1x2x14x1xf32> to vector<1xf32>
    %132 = vector.shape_cast %131 : vector<1xf32> to vector<1x1x1x1xf32>
    %133 = vector.extract %132[0, 0, 0, 0] : f32 from vector<1x1x1x1xf32>
    %134 = arith.mulf %127, %127 : vector<2x1x1xf32>
    %135 = arith.mulf %128, %128 : vector<2x1x1xf32>
    %136 = arith.addf %134, %135 : vector<2x1x1xf32>
    %137 = vector.shape_cast %136 : vector<2x1x1xf32> to vector<1x2x1x1xf32>
    %cst_22 = arith.constant dense<0.000000e+00> : vector<1xf32>
    %138 = vector.multi_reduction <add>, %137, %cst_22 [1, 2, 3] : vector<1x2x1x1xf32> to vector<1xf32>
    %139 = vector.shape_cast %138 : vector<1xf32> to vector<1x1x1x1xf32>
    %140 = vector.extract %139[0, 0, 0, 0] : f32 from vector<1x1x1x1xf32>
    %141 = arith.addf %133, %140 : f32
    %142 = arith.addf %123, %141 : f32
    %143 = vector.extract_strided_slice %105 {offsets = [0, 2, 0], sizes = [2, 14, 1], strides = [1, 1, 1]} : vector<2x16x1xf32> to vector<2x14x1xf32>
    %144 = vector.extract_strided_slice %105 {offsets = [0, 0, 0], sizes = [2, 14, 1], strides = [1, 1, 1]} : vector<2x16x1xf32> to vector<2x14x1xf32>
    %145 = arith.subf %143, %144 : vector<2x14x1xf32>
    %146 = vector.extract_strided_slice %105 {offsets = [0, 1, 0], sizes = [2, 1, 1], strides = [1, 1, 1]} : vector<2x16x1xf32> to vector<2x1x1xf32>
    %147 = vector.extract_strided_slice %105 {offsets = [0, 14, 0], sizes = [2, 1, 1], strides = [1, 1, 1]} : vector<2x16x1xf32> to vector<2x1x1xf32>
    %148 = arith.mulf %145, %145 : vector<2x14x1xf32>
    %149 = vector.shape_cast %148 : vector<2x14x1xf32> to vector<1x2x14x1xf32>
    %cst_23 = arith.constant dense<0.000000e+00> : vector<1xf32>
    %150 = vector.multi_reduction <add>, %149, %cst_23 [1, 2, 3] : vector<1x2x14x1xf32> to vector<1xf32>
    %151 = vector.shape_cast %150 : vector<1xf32> to vector<1x1x1x1xf32>
    %152 = vector.extract %151[0, 0, 0, 0] : f32 from vector<1x1x1x1xf32>
    %153 = arith.mulf %146, %146 : vector<2x1x1xf32>
    %154 = arith.mulf %147, %147 : vector<2x1x1xf32>
    %155 = arith.addf %153, %154 : vector<2x1x1xf32>
    %156 = vector.shape_cast %155 : vector<2x1x1xf32> to vector<1x2x1x1xf32>
    %cst_24 = arith.constant dense<0.000000e+00> : vector<1xf32>
    %157 = vector.multi_reduction <add>, %156, %cst_24 [1, 2, 3] : vector<1x2x1x1xf32> to vector<1xf32>
    %158 = vector.shape_cast %157 : vector<1xf32> to vector<1x1x1x1xf32>
    %159 = vector.extract %158[0, 0, 0, 0] : f32 from vector<1x1x1x1xf32>
    %160 = arith.addf %152, %159 : f32
    %161 = arith.addf %142, %160 : f32
    %162 = arith.addf %88, %161 : f32
    %cst_25 = arith.constant 0.00999999977 : f32
    %163 = arith.mulf %cst_25, %162 : f32
    %164 = arith.addf %15, %163 : f32
    %165 = arith.addf %cst, %164 : f32
    %c1_i32 = arith.constant 1 : i32
    %166 = arith.addf %3, %165 : f32
    %c0_26 = arith.constant 0 : index
    %167 = memref.load %arg4[%c0_26] : memref<1xf32, #tpu.memory_space<smem>>
    memref.store %166, %arg4[%c0_26] : memref<1xf32, #tpu.memory_space<smem>>
    %c0_i32_27 = arith.constant 0 : i32
    %168 = arith.cmpi eq, %arg0, %c0_i32_27 : i32
    %169 = arith.extui %168 : i1 to i32
    %c0_i32_28 = arith.constant 0 : i32
    %170 = arith.cmpi ne, %169, %c0_i32_28 : i32
    scf.if %170 {
      %c0_29 = arith.constant 0 : index
      %171 = memref.load %arg4[%c0_29] : memref<1xf32, #tpu.memory_space<smem>>
      %cst_30 = arith.constant 0.001953125 : f32
      %172 = arith.mulf %171, %cst_30 : f32
      %c0_31 = arith.constant 0 : index
      %173 = memref.load %arg3[%c0_31] : memref<1xf32, #tpu.memory_space<smem>>
      memref.store %172, %arg3[%c0_31] : memref<1xf32, #tpu.memory_space<smem>>
    } else {
    }
    return
  }
  func.func @transform_0(%arg0: i32) -> (i32, i32, i32) {
    %c0_i32 = arith.constant 0 : i32
    %c0_i32_0 = arith.constant 0 : i32
    %c0_i32_1 = arith.constant 0 : i32
    return %arg0, %c0_i32, %c0_i32_0 : i32, i32, i32
  }
  func.func @transform_1(%arg0: i32) -> (i32, i32, i32) {
    %c0_i32 = arith.constant 0 : i32
    %c0_i32_0 = arith.constant 0 : i32
    %c0_i32_1 = arith.constant 0 : i32
    return %arg0, %c0_i32, %c0_i32_0 : i32, i32, i32
  }
  func.func @transform_2(%arg0: i32) -> i32 {
    %c0_i32 = arith.constant 0 : i32
    %c0_i32_0 = arith.constant 0 : i32
    return %c0_i32 : i32
  }
}

</mosaic_0001>

<bundles_post_ra>
// kernel: mse_sobel_loss.1
= control target key start
LH: loop header
LB: loop body
LE: loop exit
PB: predicated region body
PF: predicated region fallthrough
CT: control target
= control target key end

     0   :  { %7 = vsyncpa [#allocation4], 0  ;;  %s1186_s0 = inlined_call_operand.hbm [shape: f32[2,16,16], index: 0, kind: input, shape index: {}]   ;;  %s1187_s1 = inlined_call_operand.hbm [shape: f32[2,16,16], index: 1, kind: input, shape index: {}]   ;;  %s1188_s2 = inlined_call_operand.hbm [shape: f32[1], index: 2, kind: output, shape index: {}]  }
   0x1   :  { %8 = vsyncpa [#allocation7], 0 }
   0x2   :  { %9 = vsyncpa [#allocation5], 0  ;;  %s823_s9 = smov [#allocation3]   ;;  %s763_s13 = scalar_lea.hbm %s1186_s0, 512 }
   0x3   :  { %s15_s10 = sshll.u32 %s823_s9, 4  ;;  %p764_p0 = scmp.ne.s32.totalorder %s1186_s0, %s763_s13  ;;  %s16_s10 = int_to_ptr.vmem [resolvable:$true] %s15_s10 }
   0x4   :  { %p767_p1 = scmp.lt.u32.totalorder %s763_s13, %s1186_s0 }
   0x6   :  { %p769_p2 = pnand %p767_p1, %p764_p0 }
   0x8   :  { %772 = shalt.err (!%p769_p2)
}
   0x9   :  { %s773_s18 = scalar_lea.vmem %s16_s10, 512  ;;  %p778_p4 = scmp.lt.s32.totalorder %s16_s10, %s16_s10 }
   0xa   :  { %p774_p3 = scmp.ne.s32.totalorder %s16_s10, %s773_s18  ;;  %p779_p5 = scmp.lt.s32.totalorder %s773_s18, %s773_s18 }
   0xc   :  { %p780_p6 = por %p779_p5, %p778_p4 }
   0xe   :  { %p781_p7 = pnand %p780_p6, %p774_p3 }
  0x10   :  { %784 = shalt.err (!%p781_p7)
}
  0x11   :  { %s824_s19 = smov 128   ;;  %s825_s20 = smov 8  }
  0x12   :  { %21 = dma.hbm_to_vmem [thread:$0]  %s1186_s0, 512, %s16_s10, [#allocation4], %s824_s19, %s824_s19, %s825_s20  }
  0x13   :  { %s826_s23 = smov [#allocation6]   ;;  %s785_s27 = scalar_lea.hbm %s1187_s1, 512 }
  0x14   :  { %s27_s24 = sshll.u32 %s826_s23, 4  ;;  %p786_p8 = scmp.ne.s32.totalorder %s1187_s1, %s785_s27  ;;  %s28_s24 = int_to_ptr.vmem [resolvable:$true] %s27_s24 }
  0x15   :  { %p789_p9 = scmp.lt.u32.totalorder %s785_s27, %s1187_s1 }
  0x17   :  { %p791_p10 = pnand %p789_p9, %p786_p8 }
  0x19   :  { %794 = shalt.err (!%p791_p10)
}
  0x1a   :  { %s795_s4 = scalar_lea.vmem %s28_s24, 512  ;;  %p800_p12 = scmp.lt.s32.totalorder %s28_s24, %s28_s24 }
  0x1b   :  { %p796_p11 = scmp.ne.s32.totalorder %s28_s24, %s795_s4  ;;  %p801_p13 = scmp.lt.s32.totalorder %s795_s4, %s795_s4 }
  0x1d   :  { %p802_p0 = por %p801_p13, %p800_p12 }
  0x1f   :  { %p803_p1 = pnand %p802_p0, %p796_p11 }
  0x21   :  { %806 = shalt.err (!%p803_p1)
}
  0x22   :  { %33 = dma.hbm_to_vmem [thread:$0]  %s1187_s1, 512, %s28_s24, [#allocation7], %s824_s19, %s824_s19, %s825_s20  }
  0x23   :  { %817 = dma.done.wait [#allocation4], 512  }
  0x24   :  { %818 = vsyncadd [#allocation4], 4294966784 }
  0x25   :  { %819 = dma.done.wait [#allocation7], 512  }
  0x26   :  { %820 = vsyncadd [#allocation7], 4294966784  ;;  %v50_v0 = vld [vmem:[#allocation3 + $0x8] sm:$0xff]  ;;  %v49_v2 = vld [vmem:[#allocation3] sm:$0xff]  ;;  %vm66_vm0 = vcmask 130048   ;;  %s827_s1 = smov 2  }
  0x27   :  { %v55_v1 = vld [vmem:[#allocation6 + $0x8] sm:$0xff]  ;;  %v51_v4 = vld [vmem:[#allocation3 + $0x10] sm:$0xff]  ;;  %v52_v5 = vld [vmem:[#allocation3 + $0x18] sm:$0xff]  ;;  %vm91_vm1 = vcmask 1046528   ;;  %vm110_vm2 = vcmask 1045504   ;;  %s828_s6 = smov 127  }
  0x28   :  { %v872_v3 = vsub.f32 %v50_v0, %v55_v1  ;;  %v54_v6 = vld [vmem:[#allocation6] sm:$0xff]  ;;  %v56_v7 = vld [vmem:[#allocation6 + $0x10] sm:$0xff]  ;;  %v57_v8 = vld [vmem:[#allocation6 + $0x18] sm:$0xff]  ;;  %s829_s7 = smov 115   ;;  %s830_s8 = smov 126   ;;  %vm438_vm3 = vcmask 1041408  }
  0x29   :  { %v874_v9 = vsub.f32 %v49_v2, %v54_v6  ;;  %v879_v11 = vsub.f32 %v51_v4, %v56_v7  ;;  %v881_v12 = vsub.f32 %v52_v5, %v57_v8  ;;  %s831_s9 = smov 114   ;;  %vm268_vm4 = vcmask 106496  }
  0x2a   :  { %v877_v10 = vmul.f32 2.0, %v872_v3  ;;  %v112_v13 = vrot.slane %v872_v3, 2  ;;  %v63_v15 = vmul.f32 %v872_v3, %v872_v3  ;;  %vm301_vm5 = vcmask 0  }
  0x2b   :  { %v62_v14 = vmul.f32 %v874_v9, %v874_v9  ;;  %v64_v17 = vmul.f32 %v879_v11, %v879_v11  ;;  %v65_v18 = vmul.f32 %v881_v12, %v881_v12  ;;  %v894_v19 = vmul.f32 2.0, %v881_v12 }
  0x2c   :  { %v93_v16 = vrot.slane %v877_v10, 1  ;;  %v68_v21 = vsel %vm66_vm0, %v63_v15, 0.0  ;;  %v115_v27 = vrot.slane %v881_v12, 2  ;;  %v902_v28 = vmul.f32 2.0, %v879_v11 }
  0x2d   :  { %v67_v20 = vsel %vm66_vm0, %v62_v14, 0.0  ;;  %v70_v24 = vsel %vm66_vm0, %v64_v17, 0.0  ;;  %v72_v25 = vsel %vm66_vm0, %v65_v18, 0.0  ;;  %v96_v26 = vrot.slane %v894_v19, 1 }
  0x2e   :  { %v897_v22 = vadd.f32 %v93_v16, %v872_v3  ;;  %v69_v23 = vadd.f32 %v68_v21, %v67_v20  ;;  %v911_v32 = vmul.f32 2.0, %v874_v9  ;;  %v95_v36 = vrot.slane %v902_v28, 1 }
  0x2f   :  { %v908_v31 = vadd.f32 %v96_v26, %v881_v12  ;;  %v114_v38 = vrot.slane %v879_v11, 2  ;;  %v111_v40 = vrot.slane %v874_v9, 2  ;;  %v125_v48 = vrot.slane %v874_v9, 1 }
  0x30   :  { %v905_v29 = vadd.f32 %v112_v13, %v897_v22  ;;  %v71_v30 = vadd.f32 %v70_v24, %v69_v23  ;;  %v92_v35 = vrot.slane %v911_v32, 1  ;;  %v97_v37 = vsel %vm91_vm1, %v95_v36, %v96_v26 }
  0x31   :  { %v916_v34 = vadd.f32 %v115_v27, %v908_v31  ;;  %v104_v41 = vadd.f32 %v97_v37, %v879_v11  ;;  %v116_v43 = vsel %vm110_vm2, %v114_v38, %v115_v27  ;;  %v113_v44 = vsel %vm110_vm2, %v111_v40, %v112_v13 }
  0x32   :  { %137 = vrot.lane.b32.xlu1 %v905_v29, %s827_s1  ;;  %v73_v33 = vadd.f32 %v72_v25, %v71_v30  ;;  %v94_v39 = vsel %vm91_vm1, %v92_v35, %v93_v16  ;;  %v948_v50 = vadd.f32 %v125_v48, %v911_v32  ;;  %v954_v51 = vmul.f32 %v905_v29, %v905_v29 }
  0x33   :  { %v102_v42 = vadd.f32 %v94_v39, %v874_v9  ;;  %v932_v45 = vadd.f32 %v116_v43, %v104_v41  ;;  %v126_v53 = vrot.slane %v879_v11, 1  ;;  %v976_v55 = vmul.f32 %v897_v22, %v897_v22 }
  0x34   :  { %74 = vadd.xlane.f32.xlu0 %v73_v33  ;;  %v958_v52 = vmul.f32 %v948_v50, %v948_v50  ;;  %v981_v56 = vmul.f32 %v908_v31, %v908_v31  ;;  %v986_v57 = vmul.f32 %v916_v34, %v916_v34  ;;  %vm171_vm6 = vcmask 113664  }
  0x35   :  { %v934_v46 = vadd.f32 %v113_v44, %v102_v42  ;;  %v191_v49 = vmul.f32 %v932_v45, %v932_v45  ;;  %v970_v54 = vadd.f32 %v126_v53, %v902_v28  ;;  %vm173_vm7 = vcmask 111616  }
  0x36   :  { %141 = vrot.lane.b32.xlu1 %v916_v34, %s827_s1  ;;  %vm231_vm8 = vcmask 5120   ;;  %vm229_vm9 = vcmask 7168  }
  0x37   :  { %v189_v47 = vmul.f32 %v934_v46, %v934_v46  ;;  %v991_v58 = vmul.f32 %v970_v54, %v970_v54 }
  0x3a   :  { %386 = vrot.lane.b32.xlu1 %v911_v32, %s828_s6 }
  0x3e   :  { %388 = vrot.lane.b32.xlu1 %v877_v10, %s828_s6 }
  0x42   :  { %139 = vrot.lane.b32.xlu1 %v932_v45, %s827_s1 }
  0x46   :  { %197 = vrot.lane.b32.xlu1 %v189_v47, %s829_s7 }
  0x4a   :  { %390 = vrot.lane.b32.xlu1 %v902_v28, %s828_s6  ;;  %135 = vrot.lane.b32.xlu0 %v934_v46, %s827_s1 }
  0x4e   :  { %392 = vrot.lane.b32.xlu1 %v894_v19, %s828_s6  ;;  %201 = vrot.lane.b32.xlu0 %v191_v49, %s829_s7 }
  0x52   :  { %199 = vrot.lane.b32.xlu1 %v954_v51, %s829_s7  ;;  %285 = vrot.lane.b32.xlu0 %v958_v52, %s829_s7 }
  0x56   :  { %318 = vrot.lane.b32.xlu1 %v897_v22, %s827_s1 }
  0x5a   :  { %320 = vrot.lane.b32.xlu1 %v908_v31, %s827_s1 }
  0x5e   :  { %250 = vrot.lane.b32.xlu1 %v948_v50, %s827_s1 }
  0x62   :  { %252 = vrot.lane.b32.xlu1 %v970_v54, %s827_s1 }
  0x66   :  { %354 = vrot.lane.b32.xlu1 %v976_v55, %s829_s7 }
  0x6a   :  { %356 = vrot.lane.b32.xlu1 %v981_v56, %s829_s7 }
  0x6e   :  { %203 = vrot.lane.b32.xlu1 %v986_v57, %s829_s7 }
  0x72   :  { %287 = vrot.lane.b32.xlu1 %v991_v58, %s829_s7 }
  0x76   :  { %402 = vrot.lane.b32.xlu1 %v874_v9, %s830_s8 }
  0x7a   :  { %404 = vrot.lane.b32.xlu1 %v872_v3, %s830_s8 }
  0x7e   :  { %418 = vrot.lane.b32.xlu1 %v874_v9, %s828_s6 }
  0x82   :  { %420 = vrot.lane.b32.xlu1 %v872_v3, %s828_s6 }
  0x86   :  { %406 = vrot.lane.b32.xlu1 %v879_v11, %s830_s8 }
  0x8a   :  { %408 = vrot.lane.b32.xlu1 %v881_v12, %s830_s8 }
  0x8e   :  { %422 = vrot.lane.b32.xlu1 %v879_v11, %s828_s6 }
  0x92   :  { %424 = vrot.lane.b32.xlu1 %v881_v12, %s828_s6 }
  0xa4   :  { %v138_v59 = vpop.permute.xlu1 %137 }
  0xa8   :  { %v1010_v60 = vpop.permute.xlu1 %141 }
  0xac   :  { %v387_v61 = vpop.permute.xlu1 %386 }
  0xad   :  { %v1024_v24 = vadd.f32 %v387_v61, %v874_v9 }
  0xb0   :  { %v389_v62 = vpop.permute.xlu1 %388 }
  0xb1   :  { %v1020_v17 = vadd.f32 %v389_v62, %v872_v3 }
  0xb3   :  { %v607_v30 = vrot.slane %v1020_v17, 6 }
  0xb4   :  { %v1012_v63 = vpop.permute.xlu1 %139 }
  0xb8   :  { %v198_v0 = vpop.permute.xlu1 %197 }
  0xb9   :  { %v209_v1 = vadd.f32 %v198_v0, %v189_v47  ;;  %v148_v0 = vsub.f32 %v905_v29, %v138_v59 }
  0xbb   :  { %217 = vrot.lane.b32.xlu0 %v209_v1, %s828_s6 }
  0xbc   :  { %v391_v2 = vpop.permute.xlu1 %390 }
  0xbd   :  { %v1035_v35 = vadd.f32 %v391_v2, %v879_v11  ;;  %v664_v2 = vmul.f32 %v1020_v17, %v1020_v17 }
  0xc0   :  { %v393_v4 = vpop.permute.xlu1 %392 }
  0xc1   :  { %v75_v5 = vpop.xlane.xlu0 %74  ;;  %v1031_v33 = vadd.f32 %v393_v4, %v881_v12  ;;  %v609_v12 = vrot.slane %v1035_v35, 6 }
  0xc2   :  { %v76_v6 = vrot.slane %v75_v5, 4 }
  0xc3   :  { %v610_v36 = vrot.slane %v1031_v33, 6 }
  0xc4   :  { %v77_v7 = vadd.f32 %v76_v6, %v75_v5  ;;  %v1015_v8 = vpop.permute.xlu1 %199 }
  0xc5   :  { %v1017_v13 = vpop.permute.xlu0 %135  ;;  %v611_v11 = vsel %vm438_vm3, %v609_v12, %v610_v36  ;;  %v149_v36 = vsub.f32 %v932_v45, %v1012_v63 }
  0xc6   :  { %v78_v14 = vrot.slane %v77_v7, 2 }
  0xc8   :  { %v319_v15 = vpop.permute.xlu1 %318  ;;  %v79_v16 = vadd.f32 %v78_v14, %v77_v7  ;;  %v150_v14 = vsub.f32 %v916_v34, %v1010_v60  ;;  %v210_v60 = vadd.f32 %v1015_v8, %v954_v51  ;;  %v153_v51 = vmul.f32 %v149_v36, %v149_v36 }
  0xc9   :  { %v324_v18 = vsub.f32 %v897_v22, %v319_v15  ;;  %v202_v20 = vpop.permute.xlu0 %201  ;;  %v606_v22 = vrot.slane %v1024_v24, 6  ;;  %v668_v15 = vrot.slane %v664_v2, 5 }
  0xca   :  { %v211_v21 = vadd.f32 %v202_v20, %v191_v49  ;;  %v80_v23 = vrot.slane %v79_v16, 1 }
  0xcb   :  { %v326_v25 = vmul.f32 %v324_v18, %v324_v18  ;;  %v608_v38 = vsel %vm438_vm3, %v606_v22, %v607_v30  ;;  %v616_v44 = vsub.f32 %v1024_v24, %v606_v22  ;;  %v662_v18 = vmul.f32 %v1024_v24, %v1024_v24 }
  0xcc   :  { %221 = vrot.lane.b32.xlu0 %v211_v21, %s828_s6  ;;  %v1027_v26 = vpop.permute.xlu1 %320  ;;  %v81_v27 = vadd.f32 %v80_v23, %v79_v16  ;;  %v617_v41 = vsub.f32 %v1020_v17, %v608_v38  ;;  %v154_v21 = vmul.f32 %v150_v14, %v150_v14  ;;  %v147_v22 = vsub.f32 %v934_v46, %v1017_v13 }
  0xcd   :  { %v330_v3 = vrot.slane %v326_v25, 6  ;;  %v286_v43 = vpop.permute.xlu0 %285  ;;  %v620_v62 = vmul.f32 %v616_v44, %v616_v44  ;;  %v672_v23 = vadd.f32 %v668_v15, %v662_v18  ;;  %v325_v46 = vsub.f32 %v908_v31, %v1027_v26 }
  0xce   :  { %727 = vpush %v81_v27  ;;  %v621_v49 = vmul.f32 %v617_v41, %v617_v41  ;;  %v291_v61 = vadd.f32 %v286_v43, %v958_v52  ;;  %v152_v52 = vmul.f32 %v148_v0, %v148_v0 }
  0xcf   :  { %v676_v27 = vrot.slane %v672_v23, 1 }
  0xd0   :  { %332 = vrot.lane.b32.xlu0 %v330_v3, %s830_s8  ;;  %v251_v9 = vpop.permute.xlu1 %250  ;;  %v629_v5 = vrot.slane %v621_v49, 2 }
  0xd1   :  { %v256_v37 = vsub.f32 %v948_v50, %v251_v9  ;;  %v619_v50 = vsub.f32 %v1031_v33, %v611_v11 }
  0xd3   :  { %v258_v39 = vmul.f32 %v256_v37, %v256_v37  ;;  %v1055_v6 = vmul.f32 %v619_v50, %v619_v50  ;;  %v151_v37 = vmul.f32 %v147_v22, %v147_v22 }
  0xd4   :  { %v253_v40 = vpop.permute.xlu1 %252 }
  0xd5   :  { %v257_v42 = vsub.f32 %v970_v54, %v253_v40  ;;  %262 = vrot.lane.b32.xlu1 %v258_v39, %s830_s8  ;;  %v618_v54 = vsub.f32 %v1035_v35, %v609_v12  ;;  %v632_v16 = vrot.slane %v1055_v6, 2 }
  0xd7   :  { %v259_v47 = vmul.f32 %v257_v42, %v257_v42  ;;  %v622_v7 = vmul.f32 %v618_v54, %v618_v54 }
  0xd8   :  { %v355_v48 = vpop.permute.xlu1 %354 }
  0xd9   :  { %v360_v53 = vadd.f32 %v355_v48, %v976_v55  ;;  %264 = vrot.lane.b32.xlu1 %v259_v47, %s830_s8  ;;  %v628_v55 = vrot.slane %v620_v62, 2  ;;  %v631_v20 = vrot.slane %v622_v7, 2 }
  0xdb   :  { %v364_v1 = vrot.slane %v360_v53, 6  ;;  %v630_v59 = vsel %vm110_vm2, %v628_v55, %v629_v5  ;;  %v633_v34 = vsel %vm110_vm2, %v631_v20, %v632_v16 }
  0xdc   :  { %v357_v4 = vpop.permute.xlu1 %356 }
  0xdd   :  { %366 = vrot.lane.b32.xlu0 %v364_v1, %s828_s6  ;;  %295 = vrot.lane.b32.xlu1 %v291_v61, %s828_s6  ;;  %v361_v11 = vadd.f32 %v357_v4, %v981_v56 }
  0xdf   :  { %v365_v54 = vrot.slane %v361_v11, 6 }
  0xe0   :  { %v204_v29 = vpop.permute.xlu1 %203 }
  0xe1   :  { %634 = vrot.lane.b32.xlu0 %v630_v59, %s831_s9  ;;  %161 = vrot.lane.b32.xlu1 %v152_v52, %s830_s8  ;;  %v212_v3 = vadd.f32 %v204_v29, %v986_v57 }
  0xe4   :  { %v288_v25 = vpop.permute.xlu1 %287 }
  0xe5   :  { %638 = vrot.lane.b32.xlu0 %v633_v34, %s831_s9  ;;  %165 = vrot.lane.b32.xlu1 %v154_v21, %s830_s8  ;;  %v292_v45 = vadd.f32 %v288_v25, %v991_v58 }
  0xe8   :  { %v403_v30 = vpop.permute.xlu1 %402 }
  0xe9   :  { %678 = vrot.lane.b32.xlu0 %v676_v27, %s831_s9  ;;  %219 = vrot.lane.b32.xlu1 %v210_v60, %s828_s6  ;;  %v1093_v63 = vadd.f32 %v403_v30, %v1024_v24  ;;  %v665_v24 = vmul.f32 %v1031_v33, %v1031_v33 }
  0xeb   :  { %v487_v31 = vmul.f32 %v1093_v63, %v1093_v63  ;;  %v669_v62 = vrot.slane %v665_v24, 5 }
  0xec   :  { %v405_v9 = vpop.permute.xlu1 %404 }
  0xed   :  { %223 = vrot.lane.b32.xlu1 %v212_v3, %s828_s6  ;;  %v1084_v57 = vadd.f32 %v405_v9, %v1020_v17  ;;  %v327_v17 = vmul.f32 %v325_v46, %v325_v46 }
  0xef   :  { %v489_v13 = vmul.f32 %v1084_v57, %v1084_v57  ;;  %v440_v21 = vrot.slane %v1084_v57, 6 }
  0xf0   :  { %v419_v38 = vpop.permute.xlu1 %418 }
  0xf1   :  { %159 = vrot.lane.b32.xlu1 %v151_v37, %s830_s8  ;;  %v493_v40 = vrot.slane %v489_v13, 5  ;;  %v430_v43 = vadd.f32 %v419_v38, %v911_v32  ;;  %v663_v32 = vmul.f32 %v1035_v35, %v1035_v35 }
  0xf3   :  { %v497_v47 = vadd.f32 %v493_v40, %v487_v31  ;;  %v570_v49 = vmul.f32 %v430_v43, %v430_v43  ;;  %v673_v55 = vadd.f32 %v669_v62, %v663_v32  ;;  %v522_v25 = vrot.slane %v430_v43, 6 }
  0xf4   :  { %v421_v8 = vpop.permute.xlu1 %420 }
  0xf5   :  { %163 = vrot.lane.b32.xlu1 %v153_v51, %s830_s8  ;;  %v1096_v39 = vadd.f32 %v421_v8, %v877_v10  ;;  %v331_v10 = vrot.slane %v327_v17, 6  ;;  %v501_v1 = vrot.slane %v497_v47, 1  ;;  %v677_v59 = vrot.slane %v673_v55, 1 }
  0xf6   :  { %v532_v37 = vsub.f32 %v430_v43, %v522_v25 }
  0xf7   :  { %v572_v26 = vmul.f32 %v1096_v39, %v1096_v39  ;;  %v505_v7 = vsel %vm268_vm4, %v501_v1, 0.0  ;;  %v523_v34 = vrot.slane %v1096_v39, 6 }
  0xf8   :  { %v407_v12 = vpop.permute.xlu1 %406 }
  0xf9   :  { %636 = vrot.lane.b32.xlu1 %v629_v5, %s831_s9  ;;  %v1104_v42 = vadd.f32 %v407_v12, %v1035_v35  ;;  %v576_v50 = vrot.slane %v572_v26, 5  ;;  %v524_v30 = vsel %vm438_vm3, %v522_v25, %v523_v34 }
  0xfa   :  { %v533_v51 = vsub.f32 %v1096_v39, %v524_v30 }
  0xfb   :  { %v488_v53 = vmul.f32 %v1104_v42, %v1104_v42  ;;  %v580_v5 = vadd.f32 %v576_v50, %v570_v49  ;;  %v442_v3 = vrot.slane %v1104_v42, 6 }
  0xfc   :  { %v409_v41 = vpop.permute.xlu1 %408  ;;  %v537_v17 = vmul.f32 %v533_v51, %v533_v51 }
  0xfd   :  { %v417_v58 = vadd.f32 %v409_v41, %v1031_v33  ;;  %297 = vrot.lane.b32.xlu1 %v292_v45, %s828_s6  ;;  %v584_v35 = vrot.slane %v580_v5, 1  ;;  %v536_v45 = vmul.f32 %v532_v37, %v532_v37  ;;  %v451_v40 = vsub.f32 %v1104_v42, %v442_v3 }
  0xfe   :  { %v545_v11 = vrot.slane %v537_v17, 2 }
  0xff   :  { %v490_v44 = vmul.f32 %v417_v58, %v417_v58  ;;  %v588_v20 = vsel %vm301_vm5, %v584_v35, 0.0  ;;  %v443_v60 = vrot.slane %v417_v58, 6  ;;  %v544_v24 = vrot.slane %v536_v45, 2  ;;  %s728_s10 = spop %727 }
 0x100   :  { %v423_v48 = vpop.permute.xlu1 %422  ;;  %v455_v43 = vmul.f32 %v451_v40, %v451_v40 }
 0x101   :  { %v494_v61 = vrot.slane %v490_v44, 5  ;;  %334 = vrot.lane.b32.xlu1 %v331_v10, %s830_s8  ;;  %v432_v33 = vadd.f32 %v423_v48, %v902_v28  ;;  %v444_v38 = vsel %vm438_vm3, %v442_v3, %v443_v60  ;;  %v546_v42 = vsel %vm110_vm2, %v544_v24, %v545_v11 }
 0x102   :  { %v452_v13 = vsub.f32 %v417_v58, %v444_v38  ;;  %v464_v48 = vrot.slane %v455_v43, 2 }
 0x103   :  { %v498_v0 = vadd.f32 %v494_v61, %v488_v53  ;;  %v571_v14 = vmul.f32 %v432_v33, %v432_v33  ;;  %v525_v22 = vrot.slane %v432_v33, 6 }
 0x104   :  { %v425_v56 = vpop.permute.xlu1 %424  ;;  %v456_v10 = vmul.f32 %v452_v13, %v452_v13 }
 0x105   :  { %368 = vrot.lane.b32.xlu1 %v365_v54, %s828_s6  ;;  %v502_v2 = vrot.slane %v498_v0, 1  ;;  %v433_v4 = vadd.f32 %v425_v56, %v894_v19  ;;  %v534_v41 = vsub.f32 %v432_v33, %v525_v22  ;;  %v554_v54 = vsel %vm229_vm9, %v546_v42, 0.0 }
 0x106   :  { %v555_v0 = vsel %vm231_vm8, %v545_v11, 0.0 }
 0x107   :  { %v506_v52 = vsel %vm268_vm4, %v502_v2, 0.0  ;;  %v573_v15 = vmul.f32 %v433_v4, %v433_v4  ;;  %v526_v9 = vrot.slane %v433_v4, 6  ;;  %v538_v44 = vmul.f32 %v534_v41, %v534_v41 }
 0x108   :  { %v507_v29 = vadd.f32 %v506_v52, %v505_v7  ;;  %v556_v56 = vadd.f32 %v555_v0, %v554_v54 }
 0x109   :  { %640 = vrot.lane.b32.xlu1 %v632_v16, %s831_s9  ;;  %v577_v28 = vrot.slane %v573_v15, 5  ;;  %v439_v16 = vrot.slane %v1093_v63, 6  ;;  %v527_v46 = vsel %vm438_vm3, %v525_v22, %v526_v9  ;;  %v547_v49 = vrot.slane %v538_v44, 2 }
 0x10a   :  { %508 = vadd.xlane.f32.xlu0 %v507_v29  ;;  %v535_v31 = vsub.f32 %v433_v4, %v527_v46 }
 0x10b   :  { %v581_v18 = vadd.f32 %v577_v28, %v571_v14  ;;  %v441_v27 = vsel %vm438_vm3, %v439_v16, %v440_v21  ;;  %v449_v8 = vsub.f32 %v1093_v63, %v439_v16  ;;  %v465_v63 = vrot.slane %v456_v10, 2 }
 0x10c   :  { %v450_v36 = vsub.f32 %v1084_v57, %v441_v27  ;;  %v539_v39 = vmul.f32 %v535_v31, %v535_v31 }
 0x10d   :  { %680 = vrot.lane.b32.xlu1 %v677_v59, %s831_s9  ;;  %v585_v19 = vrot.slane %v581_v18, 1  ;;  %v453_v26 = vmul.f32 %v449_v8, %v449_v8  ;;  %v466_v53 = vsel %vm110_vm2, %v464_v48, %v465_v63  ;;  %v476_v55 = vsel %vm173_vm7, %v465_v63, 0.0  ;;  %s807_s9 = scalar_lea.hbm %s1188_s2, 16 }
 0x10e   :  { %v454_v12 = vmul.f32 %v450_v36, %v450_v36  ;;  %v548_v50 = vrot.slane %v539_v39, 2  ;;  %v474_v33 = vsel %vm171_vm6, %v466_v53, 0.0  ;;  %p808_p2 = scmp.ne.s32.totalorder %s1188_s2, %s807_s9  ;;  %p811_p3 = scmp.lt.u32.totalorder %s807_s9, %s1188_s2 }
 0x10f   :  { %v589_v23 = vsel %vm301_vm5, %v585_v19, 0.0  ;;  %v461_v47 = vrot.slane %v453_v26, 2 }
 0x110   :  { %v590_v6 = vadd.f32 %v589_v23, %v588_v20  ;;  %v462_v57 = vrot.slane %v454_v12, 2  ;;  %v549_v1 = vsel %vm110_vm2, %v547_v49, %v548_v50  ;;  %v559_v7 = vsel %vm231_vm8, %v548_v50, 0.0  ;;  %p813_p4 = pnand %p811_p3, %p808_p2 }
 0x111   :  { %v557_v2 = vsel %vm229_vm9, %v549_v1, 0.0 }
 0x112   :  { %591 = vadd.xlane.f32.xlu0 %v590_v6  ;;  %v463_v58 = vsel %vm110_vm2, %v461_v47, %v462_v57  ;;  %v472_v62 = vsel %vm173_vm7, %v462_v57, 0.0  ;;  %v558_v5 = vadd.f32 %v557_v2, %v556_v56 }
 0x113   :  { %v471_v61 = vsel %vm171_vm6, %v463_v58, 0.0 }
 0x114   :  { %v473_v32 = vadd.f32 %v472_v62, %v471_v61  ;;  %v560_v14 = vadd.f32 %v559_v7, %v558_v5 }
 0x116   :  { %v475_v4 = vadd.f32 %v474_v33, %v473_v32 }
 0x118   :  { %v477_v52 = vadd.f32 %v476_v55, %v475_v4 }
 0x12d   :  { %v218_v23 = vpop.permute.xlu0 %217 }
 0x12e   :  { %v230_v24 = vsel %vm229_vm9, %v218_v23, 0.0 }
 0x131   :  { %478 = vadd.xlane.f32.xlu1 %v477_v52 }
 0x135   :  { %561 = vadd.xlane.f32.xlu1 %v560_v14 }
 0x13e   :  { %v222_v34 = vpop.permute.xlu0 %221 }
 0x13f   :  { %v234_v49 = vsel %vm229_vm9, %v222_v34, 0.0 }
 0x142   :  { %v333_v16 = vpop.permute.xlu0 %332 }
 0x143   :  { %v338_v51 = vsel %vm268_vm4, %v333_v16, 0.0 }
 0x147   :  { %v263_v15 = vpop.permute.xlu1 %262 }
 0x148   :  { %v269_v28 = vsel %vm268_vm4, %v263_v15, 0.0 }
 0x14b   :  { %v265_v29 = vpop.permute.xlu1 %264 }
 0x14c   :  { %v270_v35 = vsel %vm268_vm4, %v265_v29, 0.0 }
 0x14d   :  { %v271_v59 = vadd.f32 %v270_v35, %v269_v28 }
 0x14f   :  { %272 = vadd.xlane.f32.xlu0 %v271_v59  ;;  %v296_v18 = vpop.permute.xlu1 %295  ;;  %v367_v27 = vpop.permute.xlu0 %366 }
 0x150   :  { %v302_v22 = vsel %vm301_vm5, %v296_v18, 0.0  ;;  %v372_v11 = vsel %vm301_vm5, %v367_v27, 0.0 }
 0x153   :  { %v162_v19 = vpop.permute.xlu1 %161  ;;  %v635_v36 = vpop.permute.xlu0 %634 }
 0x154   :  { %v174_v45 = vsel %vm173_vm7, %v162_v19, 0.0  ;;  %v646_v17 = vsel %vm229_vm9, %v635_v36, 0.0 }
 0x157   :  { %v166_v20 = vpop.permute.xlu1 %165  ;;  %v639_v31 = vpop.permute.xlu0 %638 }
 0x158   :  { %v649_v63 = vsel %vm229_vm9, %v639_v31, 0.0  ;;  %v178_v42 = vsel %vm173_vm7, %v166_v20, 0.0 }
 0x15b   :  { %v220_v21 = vpop.permute.xlu1 %219  ;;  %v679_v1 = vpop.permute.xlu0 %678 }
 0x15c   :  { %v232_v40 = vsel %vm231_vm8, %v220_v21, 0.0  ;;  %v684_v56 = vsel %vm301_vm5, %v679_v1, 0.0 }
 0x15d   :  { %v233_v44 = vadd.f32 %v232_v40, %v230_v24 }
 0x15f   :  { %v224_v25 = vpop.permute.xlu1 %223  ;;  %v235_v62 = vadd.f32 %v234_v49, %v233_v44 }
 0x160   :  { %v236_v54 = vsel %vm231_vm8, %v224_v25, 0.0 }
 0x161   :  { %v237_v33 = vadd.f32 %v236_v54, %v235_v62 }
 0x163   :  { %v160_v6 = vpop.permute.xlu1 %159 }
 0x164   :  { %v172_v8 = vsel %vm171_vm6, %v160_v6, 0.0 }
 0x165   :  { %v175_v26 = vadd.f32 %v174_v45, %v172_v8 }
 0x167   :  { %v164_v60 = vpop.permute.xlu1 %163 }
 0x168   :  { %v176_v41 = vsel %vm171_vm6, %v164_v60, 0.0 }
 0x169   :  { %v177_v39 = vadd.f32 %v176_v41, %v175_v26 }
 0x16b   :  { %v637_v30 = vpop.permute.xlu1 %636  ;;  %v179_v53 = vadd.f32 %v178_v42, %v177_v39 }
 0x16c   :  { %v647_v46 = vsel %vm231_vm8, %v637_v30, 0.0 }
 0x16d   :  { %v648_v10 = vadd.f32 %v647_v46, %v646_v17 }
 0x16f   :  { %v298_v3 = vpop.permute.xlu1 %297  ;;  %v650_v48 = vadd.f32 %v649_v63, %v648_v10 }
 0x170   :  { %v303_v9 = vsel %vm301_vm5, %v298_v3, 0.0 }
 0x171   :  { %v304_v37 = vadd.f32 %v303_v9, %v302_v22 }
 0x173   :  { %305 = vadd.xlane.f32.xlu1 %v304_v37  ;;  %v335_v38 = vpop.permute.xlu1 %334 }
 0x174   :  { %v339_v13 = vsel %vm268_vm4, %v335_v38, 0.0 }
 0x175   :  { %v340_v12 = vadd.f32 %v339_v13, %v338_v51 }
 0x177   :  { %v369_v57 = vpop.permute.xlu1 %368  ;;  %341 = vadd.xlane.f32.xlu0 %v340_v12 }
 0x178   :  { %v373_v43 = vsel %vm301_vm5, %v369_v57, 0.0 }
 0x179   :  { %v374_v47 = vadd.f32 %v373_v43, %v372_v11 }
 0x17b   :  { %v641_v58 = vpop.permute.xlu1 %640  ;;  %375 = vadd.xlane.f32.xlu0 %v374_v47 }
 0x17c   :  { %v651_v50 = vsel %vm231_vm8, %v641_v58, 0.0 }
 0x17d   :  { %v652_v61 = vadd.f32 %v651_v50, %v650_v48 }
 0x17f   :  { %v681_v0 = vpop.permute.xlu1 %680  ;;  %180 = vadd.xlane.f32.xlu0 %v179_v53  ;;  %653 = vadd.xlane.f32.xlu1 %v652_v61 }
 0x180   :  { %v685_v32 = vsel %vm301_vm5, %v681_v0, 0.0 }
 0x181   :  { %v686_v2 = vadd.f32 %v685_v32, %v684_v56 }
 0x183   :  { %238 = vadd.xlane.f32.xlu0 %v237_v33 }
 0x187   :  { %687 = vadd.xlane.f32.xlu0 %v686_v2 }
 0x197   :  { %v509_v4 = vpop.xlane.xlu0 %508 }
 0x198   :  { %v510_v19 = vrot.slane %v509_v4, 4 }
 0x19a   :  { %v511_v22 = vadd.f32 %v510_v19, %v509_v4 }
 0x19c   :  { %v512_v31 = vrot.slane %v511_v22, 2 }
 0x19e   :  { %v513_v33 = vadd.f32 %v512_v31, %v511_v22 }
 0x19f   :  { %v592_v5 = vpop.xlane.xlu0 %591 }
 0x1a0   :  { %v593_v16 = vrot.slane %v592_v5, 4 }
 0x1a2   :  { %v594_v13 = vadd.f32 %v593_v16, %v592_v5 }
 0x1a4   :  { %v595_v47 = vrot.slane %v594_v13, 2 }
 0x1be   :  { %v479_v55 = vpop.xlane.xlu1 %478 }
 0x1bf   :  { %v480_v20 = vrot.slane %v479_v55, 4 }
 0x1c1   :  { %v481_v9 = vadd.f32 %v480_v20, %v479_v55  ;;  %v596_v55 = vadd.f32 %v595_v47, %v594_v13 }
 0x1c2   :  { %v562_v52 = vpop.xlane.xlu1 %561 }
 0x1c3   :  { %v563_v60 = vrot.slane %v562_v52, 4  ;;  %v482_v26 = vrot.slane %v481_v9, 2 }
 0x1c5   :  { %v564_v12 = vadd.f32 %v563_v60, %v562_v52  ;;  %v483_v62 = vadd.f32 %v482_v26, %v481_v9 }
 0x1c7   :  { %v565_v63 = vrot.slane %v564_v12, 2 }
 0x1c9   :  { %v566_v56 = vadd.f32 %v565_v63, %v564_v12 }
 0x1dc   :  { %v273_v7 = vpop.xlane.xlu0 %272 }
 0x1dd   :  { %v274_v29 = vrot.slane %v273_v7, 4 }
 0x1df   :  { %v275_v21 = vadd.f32 %v274_v29, %v273_v7  ;;  %v514_v29 = vrot.slane %v513_v33, 1 }
 0x1e1   :  { %v276_v36 = vrot.slane %v275_v21, 2 }
 0x1e3   :  { %v277_v24 = vadd.f32 %v276_v36, %v275_v21 }
 0x1e5   :  { %v278_v61 = vrot.slane %v277_v24, 1 }
 0x1e7   :  { %v279_v52 = vadd.f32 %v278_v61, %v277_v24 }
 0x200   :  { %v306_v15 = vpop.xlane.xlu1 %305 }
 0x201   :  { %v307_v35 = vrot.slane %v306_v15, 4 }
 0x203   :  { %v308_v25 = vadd.f32 %v307_v35, %v306_v15  ;;  %v567_v35 = vrot.slane %v566_v56, 1 }
 0x204   :  { %v342_v14 = vpop.xlane.xlu0 %341 }
 0x205   :  { %v343_v59 = vrot.slane %v342_v14, 4  ;;  %v309_v51 = vrot.slane %v308_v25, 2 }
 0x207   :  { %v344_v27 = vadd.f32 %v343_v59, %v342_v14  ;;  %v310_v39 = vadd.f32 %v309_v51, %v308_v25  ;;  %v484_v14 = vrot.slane %v483_v62, 1  ;;  %v568_v25 = vadd.f32 %v567_v35, %v566_v56 }
 0x208   :  { %v376_v28 = vpop.xlane.xlu0 %375 }
 0x209   :  { %v377_v18 = vrot.slane %v376_v28, 4  ;;  %v345_v45 = vrot.slane %v344_v27, 2  ;;  %v311_v1 = vrot.slane %v310_v39, 1  ;;  %v485_v20 = vadd.f32 %v484_v14, %v483_v62 }
 0x20b   :  { %v378_v30 = vadd.f32 %v377_v18, %v376_v28  ;;  %v346_v58 = vadd.f32 %v345_v45, %v344_v27  ;;  %v312_v15 = vadd.f32 %v311_v1, %v310_v39  ;;  %v597_v18 = vrot.slane %v596_v55, 1 }
 0x20c   :  { %v181_v23 = vpop.xlane.xlu0 %180  ;;  %v654_v34 = vpop.xlane.xlu1 %653 }
 0x20d   :  { %v182_v6 = vrot.slane %v181_v23, 4  ;;  %v655_v37 = vrot.slane %v654_v34, 4  ;;  %v379_v17 = vrot.slane %v378_v30, 2  ;;  %v347_v32 = vrot.slane %v346_v58, 1 }
 0x20f   :  { %v183_v3 = vadd.f32 %v182_v6, %v181_v23  ;;  %v656_v10 = vadd.f32 %v655_v37, %v654_v34  ;;  %v380_v50 = vadd.f32 %v379_v17, %v378_v30  ;;  %v348_v28 = vadd.f32 %v347_v32, %v346_v58 }
 0x210   :  { %v239_v38 = vpop.xlane.xlu0 %238  ;;  %v515_v23 = vadd.f32 %v514_v29, %v513_v33  ;;  %v598_v34 = vadd.f32 %v597_v18, %v596_v55 }
 0x211   :  { %v184_v8 = vrot.slane %v183_v3, 2  ;;  %v240_v46 = vrot.slane %v239_v38, 4  ;;  %v657_v53 = vrot.slane %v656_v10, 2  ;;  %v381_v5 = vrot.slane %v380_v50, 1 }
 0x213   :  { %v241_v40 = vadd.f32 %v240_v46, %v239_v38  ;;  %v185_v41 = vadd.f32 %v184_v8, %v183_v3  ;;  %v658_v7 = vadd.f32 %v657_v53, %v656_v10  ;;  %v382_v59 = vadd.f32 %v381_v5, %v380_v50 }
 0x214   :  { %v688_v57 = vpop.xlane.xlu0 %687 }
 0x215   :  { %v242_v11 = vrot.slane %v241_v40, 2  ;;  %v689_v43 = vrot.slane %v688_v57, 4  ;;  %v186_v44 = vrot.slane %v185_v41, 1  ;;  %v659_v21 = vrot.slane %v658_v7, 1 }
 0x217   :  { %v690_v48 = vadd.f32 %v689_v43, %v688_v57  ;;  %v187_v49 = vadd.f32 %v186_v44, %v185_v41  ;;  %v243_v42 = vadd.f32 %v242_v11, %v241_v40  ;;  %v660_v16 = vadd.f32 %v659_v21, %v658_v7 }
 0x219   :  { %v691_v54 = vrot.slane %v690_v48, 2  ;;  %729 = vpush %v187_v49  ;;  %v244_v0 = vrot.slane %v243_v42, 1 }
 0x21b   :  { %v692_v2 = vadd.f32 %v691_v54, %v690_v48  ;;  %v245_v4 = vadd.f32 %v244_v0, %v243_v42 }
 0x21d   :  { %731 = vpush %v245_v4  ;;  %v693_v19 = vrot.slane %v692_v2, 1 }
 0x21e   :  { %733 = vpush %v279_v52 }
 0x21f   :  { %735 = vpush %v312_v15  ;;  %v694_v6 = vadd.f32 %v693_v19, %v692_v2 }
 0x220   :  { %737 = vpush %v348_v28 }
 0x221   :  { %739 = vpush %v382_v59 }
 0x222   :  { %741 = vpush %v485_v20 }
 0x223   :  { %743 = vpush %v515_v23 }
 0x224   :  { %745 = vpush %v568_v25 }
 0x225   :  { %747 = vpush %v598_v34 }
 0x226   :  { %749 = vpush %v660_v16 }
 0x227   :  { %751 = vpush %v694_v6 }
 0x24a   :  { %s730_s11 = spop %729 }
 0x24e   :  { %s732_s12 = spop %731 }
 0x24f   :  { %s734_s13 = spop %733  ;;  %s247_s15 = sadd.f32 %s732_s12, %s730_s11 }
 0x250   :  { %s736_s14 = spop %735 }
 0x251   :  { %s738_s16 = spop %737  ;;  %s314_s17 = sadd.f32 %s736_s14, %s734_s13 }
 0x252   :  { %s740_s18 = spop %739 }
 0x253   :  { %s742_s19 = spop %741  ;;  %s315_s23 = sadd.f32 %s314_s17, %s247_s15 }
 0x254   :  { %s744_s20 = spop %743  ;;  %s384_s27 = sadd.f32 %s740_s18, %s738_s16 }
 0x255   :  { %s517_s21 = sadd.f32 %s744_s20, %s742_s19  ;;  %s746_s22 = spop %745 }
 0x256   :  { %s748_s24 = spop %747  ;;  %s385_s3 = sadd.f32 %s384_s27, %s315_s23 }
 0x257   :  { %s600_s25 = sadd.f32 %s748_s24, %s746_s22  ;;  %s750_s26 = spop %749 }
 0x258   :  { %s752_s28 = spop %751 }
 0x259   :  { %s601_s29 = sadd.f32 %s600_s25, %s517_s21 }
 0x25a   :  { %s696_s30 = sadd.f32 %s752_s28, %s750_s26 }
 0x25c   :  { %s697_s4 = sadd.f32 %s696_s30, %s601_s29 }
 0x25e   :  { %s698_s0 = sadd.f32 %s697_s4, %s385_s3 }
 0x260   :  { %s699_s5 = smul.f32 0.01, %s698_s0 }
 0x262   :  { %s700_s1 = sadd.f32 %s728_s10, %s699_s5 }
 0x264   :  { %s709_s6 = smul.f32 0.001953125, %s700_s1 }
 0x266   :  { %711 = sst [smem:[#allocation8]] %s709_s6 }
 0x267   :  { %816 = shalt.err (!%p813_p4)
}
 0x268   :  { %s832_s15 = smov [#allocation8]  }
 0x269   :  { %719 = dma.smem_to_hbm %s832_s15, 16, %s1188_s2, [#allocation5]  }
 0x26a   :  { %821 = dma.done.wait [#allocation5], 16  }
 0x26b   :  { %822 = vsyncadd [#allocation5], 4294967280 }
 0x26c   :  { %723 = sfence }
 0x26d   :  { %724 = vsyncpa [#allocation4], 1 }
 0x26e   :  { %725 = vsyncpa [#allocation7], 1 }
 0x26f   :  { %726 = vsyncpa [#allocation5], 1 }

</bundles_post_ra>
